<compile_context>
chip_gen: v6e
topology: v6e:2x2x1
jax: 0.10.0
libtpu: 0.0.40
codegen_flags: <defaults>
</compile_context>

<pallas_src>
import jax
import jax.numpy as jnp
from jax.experimental import pallas as pl
from jax.experimental.pallas import tpu as pltpu


def _round_up(x, m):
    return (x + m - 1) // m * m


def mlp_critic_kernel(xT_ref, w1_ref, b1_ref, w2_ref, b2_ref, w3_ref, b3_ref,
                      out_ref):
    xT = xT_ref[...]                                         # (obs_dim, TILE_B)

    # Layer 1: Linear(obs_dim -> h1) + Tanh, feature-major. f32 accumulate.
    h1 = jnp.tanh(
        jnp.dot(w1_ref[...], xT, preferred_element_type=jnp.float32)
        + b1_ref[...])                                       # (h1, TILE_B) f32
    # Layer 2: Linear(h1 -> h2) + Tanh.
    h2 = jnp.tanh(
        jnp.dot(w2_ref[...], h1.astype(w2_ref.dtype),
                preferred_element_type=jnp.float32)
        + b2_ref[...])                                       # (h2, TILE_B) f32
    # Layer 3: Linear(h2 -> 1) + Identity.  w3 is in PyTorch layout (1, h2),
    # which is exactly the LHS we need: result is a lane-dense (1, TILE_B) row.
    v = jnp.dot(w3_ref[...], h2.astype(w3_ref.dtype),
                preferred_element_type=jnp.float32) + b3_ref[0, 0]

    out_ref[...] = v.astype(out_ref.dtype)                   # (1, TILE_B)


def mlp_critic_forward(obs, params, *, tile_b=8192, stream_dtype=jnp.bfloat16):
    """obs: [B, obs_dim]; params in PyTorch nn.Linear layout (weight = [out, in]).

    Returns value estimates of shape [B] (== torch.squeeze(v_net(obs), -1)).
    stream_dtype controls the MXU-operand dtype (bf16 default; pass
    jnp.float32 for exact f32 semantics).  Accumulation/biases/tanh are
    always f32.
    """
    B, obs_dim = obs.shape
    dtype = jnp.dtype(stream_dtype) if stream_dtype is not None else obs.dtype
    h1 = params["w1"].shape[0]
    h2 = params["w2"].shape[0]

    # MXU-facing operands in the streaming dtype (PyTorch (out,in) layout is
    # already the weight-as-LHS layout we want); biases stay f32 column vectors.
    w1 = params["w1"].astype(dtype)                       # (h1, obs_dim)
    w2 = params["w2"].astype(dtype)                       # (h2, h1)
    w3 = params["w3"].astype(dtype)                       # (1,  h2)
    b1 = params["b1"].reshape(h1, 1).astype(jnp.float32)
    b2 = params["b2"].reshape(h2, 1).astype(jnp.float32)
    b3 = params["b3"].reshape(1, 1).astype(jnp.float32)

    # TODO(synk): ideally the data producer emits obs feature-major
    # (obs_dim, B) already in the streaming dtype; this fused transpose+cast
    # is one extra HBM pass over obs (cheap, but avoidable upstream).
    x_t = jnp.transpose(obs).astype(dtype)                # (obs_dim, B)

    # Batch tile: multiple of 128 (lane-dense blocks), capped so per-step VMEM
    # stays well inside every generation's default scoped limit.
    tile_b = max(128, min(int(tile_b), 32768))
    tile_b = min(_round_up(tile_b, 128), _round_up(B, 128))
    num_tiles = pl.cdiv(B, tile_b)                        # ragged tail is masked

    def const_spec(shape):
        # Same block index every grid step -> tensor stays resident in VMEM.
        return pl.BlockSpec(shape, lambda i: (0, 0))

    out = pl.pallas_call(
        mlp_critic_kernel,
        out_shape=jax.ShapeDtypeStruct((1, B), jnp.float32),
        grid=(num_tiles,),
        in_specs=[
            pl.BlockSpec((obs_dim, tile_b), lambda i: (0, i)),   # obs stream
            const_spec(w1.shape), const_spec(b1.shape),          # pinned weights
            const_spec(w2.shape), const_spec(b2.shape),
            const_spec(w3.shape),
            pl.BlockSpec(memory_space=pltpu.MemorySpace.SMEM),   # scalar b3
        ],
        out_specs=pl.BlockSpec((1, tile_b), lambda i: (0, i)),
        compiler_params=pltpu.CompilerParams(
            dimension_semantics=("parallel",)),
    )(x_t, w1, b1, w2, b2, w3, b3)

    # squeeze(-1) / un-tiling is glue; done outside the kernel.
    return out.reshape(B)


def init_params(key, obs_dim, hidden_sizes):
    """Deterministic synthetic init, PyTorch nn.Linear layout: w=[out,in], b=[out]."""
    sizes = [obs_dim] + list(hidden_sizes) + [1]
    keys = jax.random.split(key, 2 * (len(sizes) - 1))
    params = {}
    for j in range(len(sizes) - 1):
        fan_in, fan_out = sizes[j], sizes[j + 1]
        bound = 1.0 / jnp.sqrt(jnp.float32(fan_in))
        w = jax.random.uniform(keys[2 * j], (fan_out, fan_in),
                               minval=-bound, maxval=bound, dtype=jnp.float32)
        b = jax.random.uniform(keys[2 * j + 1], (fan_out,),
                               minval=-bound, maxval=bound, dtype=jnp.float32)
        params[f"w{j + 1}"] = w
        params[f"b{j + 1}"] = b
    return params


def reference_forward(obs, params):
    h = jnp.tanh(obs @ params["w1"].T + params["b1"])
    h = jnp.tanh(h @ params["w2"].T + params["b2"])
    v = h @ params["w3"].T + params["b3"]
    return jnp.squeeze(v, axis=-1)


if __name__ == "__main__":
    key = jax.random.PRNGKey(0)
    k_obs, k_params = jax.random.split(key)

    batch = 8
    obs_dim = 16
    hidden_sizes = (32, 32)  # activation = Tanh (SpinningUp-style critic)

    obs = jax.random.normal(k_obs, (batch, obs_dim), dtype=jnp.float32)
    params = init_params(k_params, obs_dim, hidden_sizes)

    v_ref = reference_forward(obs, params)

    # Exact f32 path: bit-for-bit semantics of the PyTorch module.
    v_f32 = mlp_critic_forward(obs, params, stream_dtype=jnp.float32)
    jax.block_until_ready(v_f32)
    assert v_f32.shape == (batch,)
    assert jnp.allclose(v_f32, v_ref, atol=1e-5, rtol=1e-5)

    # Default path: bf16 MXU operands, f32 accumulate/biases/tanh.
    v = mlp_critic_forward(obs, params)
    jax.block_until_ready(v)
    assert v.shape == (batch,)
    assert jnp.allclose(v, v_ref, atol=5e-2, rtol=5e-2)

    print("KERNEL_OK")
</pallas_src>

<mosaic_0001>
module attributes {stable_mosaic.version = 11 : i64} {
  func.func @mlp_critic_kernel(%arg0: i32, %arg1: memref<16x128xf32, #tpu.memory_space<vmem>>, %arg2: memref<32x16xf32, #tpu.memory_space<vmem>>, %arg3: memref<32x1xf32, #tpu.memory_space<vmem>>, %arg4: memref<32x32xf32, #tpu.memory_space<vmem>>, %arg5: memref<32x1xf32, #tpu.memory_space<vmem>>, %arg6: memref<1x32xf32, #tpu.memory_space<vmem>>, %arg7: memref<1x1xf32, #tpu.memory_space<smem>>, %arg8: memref<1x128xf32, #tpu.memory_space<vmem>>) attributes {dimension_semantics = [#tpu.dimension_semantics<parallel>], iteration_bounds = array<i64: 1>, scalar_prefetch = 0 : i64, scratch_operands = 0 : i64, tpu.core_type = #tpu.core_type<tc>, window_params = [{transform_indices = @transform_0, window_bounds = array<i64: 16, 128>}, {pipeline_mode = #tpu.pipeline_mode<synchronous>, transform_indices = @transform_1, window_bounds = array<i64: 32, 16>}, {pipeline_mode = #tpu.pipeline_mode<synchronous>, transform_indices = @transform_2, window_bounds = array<i64: 32, 1>}, {pipeline_mode = #tpu.pipeline_mode<synchronous>, transform_indices = @transform_3, window_bounds = array<i64: 32, 32>}, {pipeline_mode = #tpu.pipeline_mode<synchronous>, transform_indices = @transform_4, window_bounds = array<i64: 32, 1>}, {pipeline_mode = #tpu.pipeline_mode<synchronous>, transform_indices = @transform_5, window_bounds = array<i64: 1, 32>}, {transform_indices = @transform_6, window_bounds = array<i64: 1, 1>}, {transform_indices = @transform_7, window_bounds = array<i64: 1, 128>}]} {
    %c0 = arith.constant 0 : index
    %c0_0 = arith.constant 0 : index
    %0 = vector.load %arg1[%c0, %c0_0] : memref<16x128xf32, #tpu.memory_space<vmem>>, vector<16x128xf32>
    %c0_1 = arith.constant 0 : index
    %c0_2 = arith.constant 0 : index
    %1 = vector.load %arg2[%c0_1, %c0_2] : memref<32x16xf32, #tpu.memory_space<vmem>>, vector<32x16xf32>
    %cst = arith.constant dense<0.000000e+00> : vector<32x128xf32>
    %2 = tpu.matmul %1, %0, %cst {dimension_numbers = #tpu.dot_dimension_numbers<[1], [0], [0], [1], [0, 0, 1, 1], [], []>} : vector<32x16xf32>, vector<16x128xf32>, vector<32x128xf32> -> vector<32x128xf32>
    %c0_3 = arith.constant 0 : index
    %c0_4 = arith.constant 0 : index
    %3 = vector.load %arg3[%c0_3, %c0_4] : memref<32x1xf32, #tpu.memory_space<vmem>>, vector<32x1xf32>
    %4 = vector.broadcast %3 : vector<32x1xf32> to vector<32x128xf32>
    %5 = arith.addf %2, %4 : vector<32x128xf32>
    %6 = math.tanh %5 : vector<32x128xf32>
    %c0_5 = arith.constant 0 : index
    %c0_6 = arith.constant 0 : index
    %7 = vector.load %arg4[%c0_5, %c0_6] : memref<32x32xf32, #tpu.memory_space<vmem>>, vector<32x32xf32>
    %cst_7 = arith.constant dense<0.000000e+00> : vector<32x128xf32>
    %8 = tpu.matmul %7, %6, %cst_7 {dimension_numbers = #tpu.dot_dimension_numbers<[1], [0], [0], [1], [0, 0, 1, 1], [], []>} : vector<32x32xf32>, vector<32x128xf32>, vector<32x128xf32> -> vector<32x128xf32>
    %c0_8 = arith.constant 0 : index
    %c0_9 = arith.constant 0 : index
    %9 = vector.load %arg5[%c0_8, %c0_9] : memref<32x1xf32, #tpu.memory_space<vmem>>, vector<32x1xf32>
    %10 = vector.broadcast %9 : vector<32x1xf32> to vector<32x128xf32>
    %11 = arith.addf %8, %10 : vector<32x128xf32>
    %12 = math.tanh %11 : vector<32x128xf32>
    %c0_10 = arith.constant 0 : index
    %c0_11 = arith.constant 0 : index
    %13 = vector.load %arg6[%c0_10, %c0_11] : memref<1x32xf32, #tpu.memory_space<vmem>>, vector<1x32xf32>
    %cst_12 = arith.constant dense<0.000000e+00> : vector<1x128xf32>
    %14 = tpu.matmul %13, %12, %cst_12 {dimension_numbers = #tpu.dot_dimension_numbers<[1], [0], [0], [1], [0, 0, 1, 1], [], []>} : vector<1x32xf32>, vector<32x128xf32>, vector<1x128xf32> -> vector<1x128xf32>
    %c0_13 = arith.constant 0 : index
    %c0_14 = arith.constant 0 : index
    %15 = memref.load %arg7[%c0_13, %c0_14] : memref<1x1xf32, #tpu.memory_space<smem>>
    %16 = vector.broadcast %15 : f32 to vector<1x128xf32>
    %17 = arith.addf %14, %16 : vector<1x128xf32>
    %c0_15 = arith.constant 0 : index
    %c0_16 = arith.constant 0 : index
    %18 = vector.load %arg8[%c0_15, %c0_16] : memref<1x128xf32, #tpu.memory_space<vmem>>, vector<1x128xf32>
    tpu.vector_store %arg8[%c0_15, %c0_16], %17 {strides = array<i32>} : memref<1x128xf32, #tpu.memory_space<vmem>>, vector<1x128xf32>,
    return
  }
  func.func @transform_0(%arg0: i32) -> (i32, i32) {
    %c0_i32 = arith.constant 0 : i32
    %c0_i32_0 = arith.constant 0 : i32
    return %c0_i32, %arg0 : i32, i32
  }
  func.func @transform_1(%arg0: i32) -> (i32, i32) {
    %c0_i32 = arith.constant 0 : i32
    %c0_i32_0 = arith.constant 0 : i32
    %c0_i32_1 = arith.constant 0 : i32
    return %c0_i32, %c0_i32_0 : i32, i32
  }
  func.func @transform_2(%arg0: i32) -> (i32, i32) {
    %c0_i32 = arith.constant 0 : i32
    %c0_i32_0 = arith.constant 0 : i32
    %c0_i32_1 = arith.constant 0 : i32
    return %c0_i32, %c0_i32_0 : i32, i32
  }
  func.func @transform_3(%arg0: i32) -> (i32, i32) {
    %c0_i32 = arith.constant 0 : i32
    %c0_i32_0 = arith.constant 0 : i32
    %c0_i32_1 = arith.constant 0 : i32
    return %c0_i32, %c0_i32_0 : i32, i32
  }
  func.func @transform_4(%arg0: i32) -> (i32, i32) {
    %c0_i32 = arith.constant 0 : i32
    %c0_i32_0 = arith.constant 0 : i32
    %c0_i32_1 = arith.constant 0 : i32
    return %c0_i32, %c0_i32_0 : i32, i32
  }
  func.func @transform_5(%arg0: i32) -> (i32, i32) {
    %c0_i32 = arith.constant 0 : i32
    %c0_i32_0 = arith.constant 0 : i32
    %c0_i32_1 = arith.constant 0 : i32
    return %c0_i32, %c0_i32_0 : i32, i32
  }
  func.func @transform_6(%arg0: i32) -> (i32, i32) {
    %c0_i32 = arith.constant 0 : i32
    %c0_i32_0 = arith.constant 0 : i32
    %c0_i32_1 = arith.constant 0 : i32
    return %c0_i32, %c0_i32_0 : i32, i32
  }
  func.func @transform_7(%arg0: i32) -> (i32, i32) {
    %c0_i32 = arith.constant 0 : i32
    %c0_i32_0 = arith.constant 0 : i32
    return %c0_i32, %arg0 : i32, i32
  }
}

</mosaic_0001>

<bundles_post_ra>
// kernel: tpu_custom_call.1
= control target key start
LH: loop header
LB: loop body
LE: loop exit
PB: predicated region body
PF: predicated region fallthrough
CT: control target
= control target key end

     0   :  { %vm58_vm0 = vcmask 130048   ;;  %v488_v4 = vmov 0   ;;  %s604_s0 = inlined_call_operand.vmem [shape: f32[16,8], index: 0, kind: input, shape index: {}]   ;;  %s605_s1 = inlined_call_operand.vmem [shape: f32[32,16], index: 1, kind: input, shape index: {}]   ;;  %s606_s2 = inlined_call_operand.vmem [shape: f32[32,1], index: 2, kind: input, shape index: {}]   ;;  %s607_s3 = inlined_call_operand.vmem [shape: f32[32,32], index: 3, kind: input, shape index: {}]   ;;  %s608_s4 = inlined_call_operand.vmem [shape: f32[32,1], index: 4, kind: input, shape index: {}]   ;;  %s609_s5 = inlined_call_operand.vmem [shape: f32[1,32], index: 5, kind: input, shape index: {}]   ;;  %s610_s6 = inlined_call_operand.<no memory space> [shape: f32[1,1], index: 6, kind: input, shape index: {}]   ;;  %s611_s7 = inlined_call_operand.hbm [shape: f32[1,8], index: 7, kind: output, shape index: {}]  }
   0x1   :  { %v29_v0 = vld [vmem:[%s604_s0 + $0x8] sm:$0xff]  ;;  %v28_v1 = vld [vmem:[%s604_s0] sm:$0xff]  ;;  %448 = vset.pattern.permute.xlu0 %v488_v4  ;;  %v37_v5 = vld [vmem:[%s606_s2 + $0x18] sm:$0xff]  ;;  %449 = vset.pattern.permute.xlu1 %v488_v4 }
   0x2   :  { %v30_v2 = vld [vmem:[%s605_s1] sm:$0xff]  ;;  %409 = vmatprep.subr.mxu0 %v29_v0  ;;  %v31_v3 = vld [vmem:[%s605_s1 + $0x8] sm:$0xff]  ;;  %v32_v7 = vld [vmem:[%s605_s1 + $0x10] sm:$0xff]  ;;  %55 = vperm.xlu0 %448, %v37_v5  }
   0x3   :  { %413 = vmatprep.mubr.msk.f32.mxu0 %vm58_vm0, %v30_v2  ;;  %410 = vmatpush3.msra.mxu0 %v29_v0  ;;  %v35_v6 = vld [vmem:[%s606_s2 + $0x8] sm:$0xff]  ;;  %v36_v8 = vld [vmem:[%s606_s2 + $0x10] sm:$0xff] }
   0x4   :  { %411 = vmatprep.subr.mxu0 %v28_v1 }
   0x5   :  { %412 = vmatpush3.msra.mxu0 %v28_v1 }
   0x6   :  { %13 = vsyncpa [#allocation4], 0  ;;  %414 = vmatmul.mubr.msk.f32.vlgmr.msra.gmra.mxu0 %vm58_vm0, %v31_v3  ;;  %45 = vperm.xlu1 %449, %v35_v6   ;;  %v33_v9 = vld [vmem:[%s605_s1 + $0x18] sm:$0xff]  ;;  %v34_v10 = vld [vmem:[%s606_s2] sm:$0xff]  ;;  %vm188_vm1 = vcmask 261120   ;;  %v489_v35 = vmov 0.0   ;;  %v292_v53 = vstv %s610_s6 }
   0x7   :  { %416 = vmatprep.mubr.msk.f32.mxu0 %vm58_vm0, %v32_v7  ;;  %50 = vperm.xlu0 %448, %v36_v8   ;;  %v167_v11 = vld [vmem:[%s608_s4 + $0x18] sm:$0xff]  ;;  %v166_v12 = vld [vmem:[%s608_s4 + $0x10] sm:$0xff]  ;;  %v165_v13 = vld [vmem:[%s608_s4 + $0x8] sm:$0xff]  ;;  %vm490_vm2 = vmmov 0   ;;  %s491_s12 = smov [#allocation3]  }
   0x8   :  { %v164_v14 = vld [vmem:[%s608_s4] sm:$0xff]  ;;  %v161_v32 = vld [vmem:[%s607_s3 + $0x8] sm:$0xff]  ;;  %v162_v33 = vld [vmem:[%s607_s3 + $0x10] sm:$0xff]  ;;  %433 = vmatprep.subr.mxu0 %v489_v35  ;;  %s373_s13 = sshll.u32 %s491_s12, 4  ;;  %s374_s13 = int_to_ptr.vmem [resolvable:$true] %s373_s13 }
   0x9   :  { %v160_v15 = vld [vmem:[%s607_s3] sm:$0xff]  ;;  %v163_v34 = vld [vmem:[%s607_s3 + $0x18] sm:$0xff]  ;;  %s466_s14 = scalar_lea.vmem %s374_s13, 16  ;;  %s470_s15 = scalar_lea.vmem %s374_s13, 32 }
   0xa   :  { %417 = vmatmul.mubr.msk.f32.gmra.mxu0 %vm58_vm0, %v33_v9  ;;  %40 = vperm.xlu1 %449, %v34_v10   ;;  %v290_v51 = vld [vmem:[%s609_s5] sm:$0x1]  ;;  %p467_p0 = scmp.ne.s32.totalorder %s374_s13, %s466_s14  ;;  %p471_p1 = scmp.lt.s32.totalorder %s374_s13, %s374_s13 }
   0xb   :  { %185 = vperm.xlu0 %448, %v167_v11   ;;  %427 = vmatprep.mubr.msk.f32.mxu1 %vm188_vm1, %v160_v15  ;;  %p472_p2 = scmp.lt.s32.totalorder %s470_s15, %s466_s14 }
   0xc   :  { %441 = vmatprep.mubr.msk.f32.mxu0 %vm490_vm2, %v489_v35 }
   0xd   :  { %p473_p3 = por %p472_p2, %p471_p1 }
   0xe   :  { %180 = vperm.xlu1 %449, %v166_v12  }
   0xf   :  { %175 = vperm.xlu0 %448, %v165_v13   ;;  %p474_p4 = pnand %p473_p3, %p467_p0 }
  0x12   :  { %170 = vperm.xlu1 %449, %v164_v14  }
  0x7d   :  { %v56_v16 = vpop.permute.xlu0 %55 }
  0x81   :  { %v46_v18 = vpop.permute.xlu1 %45 }
  0x82   :  { %v51_v22 = vpop.permute.xlu0 %50 }
  0x85   :  { %v41_v26 = vpop.permute.xlu1 %40 }
  0x86   :  { %v186_v36 = vpop.permute.xlu0 %185 }
  0x89   :  { %v181_v38 = vpop.permute.xlu1 %180 }
  0x8a   :  { %v176_v42 = vpop.permute.xlu0 %175 }
  0x8d   :  { %v171_v46 = vpop.permute.xlu1 %170 }
  0xc6   :  { %v415_v17 = vpop.f32.mrf.mxu0 }
  0xc7   :  { %v143_v24 = vadd.f32 %v415_v17, %v46_v18 }
  0xc8   :  { %v137_v19 = vpop.f32.mrf.mxu0 }
  0xc9   :  { %v138_v27 = vadd.f32 %v137_v19, %v41_v26 }
  0xca   :  { %v418_v20 = vpop.f32.mrf.mxu0 }
  0xcb   :  { %v153_v21 = vadd.f32 %v418_v20, %v56_v16 }
  0xcc   :  { %v147_v23 = vpop.f32.mrf.mxu0 }
  0xcd   :  { %450 = vtanh.f32 %v153_v21  ;;  %v148_v25 = vadd.f32 %v147_v23, %v51_v22 }
  0xcf   :  { %452 = vtanh.f32 %v148_v25 }
  0xd0   :  { %454 = vtanh.f32 %v143_v24 }
  0xd1   :  { %456 = vtanh.f32 %v138_v27 }
  0xda   :  { %v451_v28 = vpop.eup %450 }
  0xdb   :  { %419 = vmatprep.subr.mxu1 %v451_v28 }
  0xdc   :  { %v453_v29 = vpop.eup %452  ;;  %420 = vmatpush3.msra.mxu1 %v451_v28 }
  0xdd   :  { %421 = vmatprep.subr.mxu1 %v453_v29  ;;  %v455_v30 = vpop.eup %454 }
  0xde   :  { %422 = vmatpush3.msra.mxu1 %v453_v29  ;;  %v457_v31 = vpop.eup %456 }
  0xdf   :  { %423 = vmatprep.subr.mxu1 %v455_v30 }
  0xe0   :  { %424 = vmatpush3.msra.mxu1 %v455_v30 }
  0xe1   :  { %425 = vmatprep.subr.mxu1 %v457_v31 }
  0xe2   :  { %426 = vmatpush3.msra.mxu1 %v457_v31 }
  0xe3   :  { %428 = vmatmul.mubr.msk.f32.vlgmr.msra.gmra.mxu1 %vm188_vm1, %v161_v32 }
  0xe4   :  { %430 = vmatprep.mubr.msk.f32.mxu1 %vm188_vm1, %v162_v33 }
  0xe7   :  { %431 = vmatmul.mubr.msk.f32.gmra.mxu1 %vm188_vm1, %v163_v34 }
 0x1a3   :  { %v429_v37 = vpop.f32.mrf.mxu1 }
 0x1a4   :  { %v273_v44 = vadd.f32 %v429_v37, %v176_v42 }
 0x1a5   :  { %v267_v39 = vpop.f32.mrf.mxu1 }
 0x1a6   :  { %v268_v47 = vadd.f32 %v267_v39, %v171_v46 }
 0x1a7   :  { %v432_v40 = vpop.f32.mrf.mxu1 }
 0x1a8   :  { %v283_v41 = vadd.f32 %v432_v40, %v186_v36 }
 0x1a9   :  { %v277_v43 = vpop.f32.mrf.mxu1 }
 0x1aa   :  { %458 = vtanh.f32 %v283_v41  ;;  %v278_v45 = vadd.f32 %v277_v43, %v181_v38 }
 0x1ac   :  { %460 = vtanh.f32 %v278_v45 }
 0x1ad   :  { %462 = vtanh.f32 %v273_v44 }
 0x1ae   :  { %464 = vtanh.f32 %v268_v47 }
 0x1b7   :  { %v459_v48 = vpop.eup %458 }
 0x1b8   :  { %434 = vmatpush3.msra.mxu0 %v459_v48 }
 0x1b9   :  { %v461_v49 = vpop.eup %460  ;;  %435 = vmatprep.subr.mxu0 %v489_v35 }
 0x1ba   :  { %436 = vmatpush3.msra.mxu0 %v461_v49  ;;  %v463_v50 = vpop.eup %462 }
 0x1bb   :  { %437 = vmatprep.subr.mxu0 %v489_v35  ;;  %v465_v52 = vpop.eup %464 }
 0x1bc   :  { %438 = vmatpush3.msra.mxu0 %v463_v50 }
 0x1bd   :  { %439 = vmatprep.subr.mxu0 %v489_v35 }
 0x1be   :  { %440 = vmatpush3.msra.mxu0 %v465_v52 }
 0x1bf   :  { %442 = vmatmul.mubr.msk.f32.vlgmr.msra.gmra.mxu0 %vm188_vm1, %v290_v51 }
 0x27f   :  { %v362_v54 = vpop.f32.mrf.mxu0 }
 0x280   :  { %v363_v55 = vadd.f32 %v362_v54, %v292_v53 }
 0x281   :  { %v443_v56 = vpop.f32.mrf.mxu0 }
 0x282   :  { %366 = vst [vmem:[#allocation3] sm:$0x1] %v363_v55 }
 0x283   :  { %477 = shalt.err (!%p474_p4)
}
 0x284   :  { %376 = dma.vmem_to_hbm [thread:$0]  %s374_s13, 16, %s611_s7, [#allocation4]  }
 0x285   :  { %486 = dma.done.wait [#allocation4], 16  }
 0x286   :  { %487 = vsyncadd [#allocation4], 4294967280 }
 0x287   :  { %380 = vsyncpa [#allocation4], 1 }

</bundles_post_ra>
